<compile_context>
chip_gen: v5e
topology: v5e:2x2
jax: 0.10.0
libtpu: 0.0.40
codegen_flags: <defaults>
</compile_context>

<pallas_src>
import functools

import jax
import jax.numpy as jnp
from jax.experimental import pallas as pl
from jax.experimental.pallas import tpu as pltpu

_INV_SQRT2 = 0.7071067811865476
_SQRT_2_OVER_PI = 0.7978845608028654


def _round_up(x, m):
    return (x + m - 1) // m * m


def _cdiv(a, b):
    return -(-a // b)


def _gelu(x, approximate):
    if approximate:
        # tanh form: transcendental goes to the EUP slot (cheap next to MXU).
        c = jnp.asarray(_SQRT_2_OVER_PI, x.dtype)
        return 0.5 * x * (1.0 + jnp.tanh(c * (x + 0.044715 * x * x * x)))
    # PyTorch nn.GELU default = exact erf formulation (multiply, not divide).
    return 0.5 * x * (1.0 + jax.lax.erf(x * jnp.asarray(_INV_SQRT2, x.dtype)))


# ---------------------------------------------------------------------------
# Generation-aware VMEM configuration.
# ---------------------------------------------------------------------------
def _query_vmem_capacity_bytes():
    try:
        info = pltpu.get_tpu_info()
        cap = int(getattr(info, "vmem_capacity_bytes", 0))
        return cap if cap > 0 else None
    except Exception:
        return None


_VMEM_CAP_BYTES = _query_vmem_capacity_bytes() or (64 * 1024 * 1024)
if _VMEM_CAP_BYTES >= 96 * 1024 * 1024:
    # v5e / v6e: 128 MiB physical; default scoped limit is only 16/32 MiB.
    _VMEM_LIMIT_BYTES = 100 * 1024 * 1024
    _SMALL_VMEM_CHIP = False
else:
    # v7x: 64 MiB physical per TensorCore; leave headroom for compiler scratch.
    _VMEM_LIMIT_BYTES = min(52 * 1024 * 1024, int(_VMEM_CAP_BYTES * 0.8))
    _SMALL_VMEM_CHIP = True


def _vmem_bytes(tm, th, din_p, dout_p, cbytes, out_bytes, use_scratch):
    """Double-buffered per-step VMEM footprint estimate."""
    b = 0
    b += 2 * tm * din_p * cbytes       # x row tile
    b += 2 * din_p * th * cbytes       # w1 H-tile
    b += 2 * 8 * th * 4                # b1 slab (sublane-padded)
    b += 2 * th * dout_p * cbytes      # w2 H-tile
    b += 2 * 8 * dout_p * 4            # b2 slab
    b += 2 * tm * dout_p * out_bytes   # output tile
    if use_scratch:
        b += tm * dout_p * 4           # f32 accumulator scratch
    return b


# ---------------------------------------------------------------------------
# Kernels.
# ---------------------------------------------------------------------------
def _mlp_kernel_scratch(x_ref, w1_ref, b1_ref, w2_ref, b2_ref, o_ref, acc_ref,
                        *, approximate_gelu):
    h_idx = pl.program_id(1)

    @pl.when(h_idx == 0)
    def _():
        acc_ref[...] = jnp.zeros_like(acc_ref)

    # fc1 for this hidden tile: (tm, Din) @ (Din, th) -> f32 (tm, th)
    h = jnp.dot(x_ref[...], w1_ref[...], preferred_element_type=jnp.float32)
    h = _gelu(h + b1_ref[...], approximate_gelu)
    # dropout(p=0.0) is identity

    # fc2 partial: accumulate (tm, th) @ (th, Dout) into f32 scratch.
    acc_ref[...] += jnp.dot(h.astype(w2_ref.dtype), w2_ref[...],
                            preferred_element_type=jnp.float32)

    @pl.when(h_idx == pl.num_programs(1) - 1)
    def _():
        o_ref[...] = (acc_ref[...] + b2_ref[...]).astype(o_ref.dtype)


def _mlp_kernel_f32out(x_ref, w1_ref, b1_ref, w2_ref, b2_ref, o_ref,
                       *, approximate_gelu):
    # Output dtype is f32: accumulate directly into the resident output block
    # (saves tm*Dout*4 bytes of scratch and one (tm, Dout) copy per row tile).
    h_idx = pl.program_id(1)

    @pl.when(h_idx == 0)
    def _():
        o_ref[...] = jnp.zeros_like(o_ref)

    h = jnp.dot(x_ref[...], w1_ref[...], preferred_element_type=jnp.float32)
    h = _gelu(h + b1_ref[...], approximate_gelu)
    o_ref[...] += jnp.dot(h.astype(w2_ref.dtype), w2_ref[...],
                          preferred_element_type=jnp.float32)

    @pl.when(h_idx == pl.num_programs(1) - 1)
    def _():
        o_ref[...] += b2_ref[...]


# ---------------------------------------------------------------------------
# Wrapper.
# ---------------------------------------------------------------------------
@functools.partial(jax.jit,
                   static_argnames=("tm", "th", "compute_dtype",
                                    "approximate_gelu"))
def mlp_pallas(x, w1, b1, w2, b2, *, tm=512, th=512,
               compute_dtype=jnp.bfloat16, approximate_gelu=False):
    """x: (B, N, Din). w1: (Din, H), b1: (H,), w2: (H, Dout), b2: (Dout,).

    Returns (B, N, Dout) in x.dtype. MXU operands are cast to compute_dtype
    (default bf16); accumulation / bias / GELU are f32.
    """
    B, N, Din = x.shape
    H = w1.shape[1]
    Dout = w2.shape[1]
    M = B * N
    out_dtype = x.dtype

    cdt = jnp.dtype(compute_dtype) if compute_dtype is not None else jnp.dtype(x.dtype)
    cbytes = cdt.itemsize
    out_bytes = jnp.dtype(out_dtype).itemsize
    use_scratch = jnp.dtype(out_dtype) != jnp.dtype(jnp.float32)

    # Lane-dense padding targets for all matmul dims.
    Din_p = _round_up(Din, 128)
    Dout_p = _round_up(Dout, 128)
    M_8 = _round_up(M, 8)
    H_128 = _round_up(H, 128)

    # Initial tile sizes.
    tm_eff = _round_up(min(tm, M_8), 8)
    th_eff = _round_up(min(th, H_128), 128)

    # VMEM accounting: shrink th, then tm, to fit the generation budget
    # (graceful degradation instead of a compile failure on huge Din/Dout/H).
    budget = int(0.8 * _VMEM_LIMIT_BYTES)
    while (_vmem_bytes(tm_eff, th_eff, Din_p, Dout_p, cbytes, out_bytes,
                       use_scratch) > budget and th_eff > 128):
        th_eff = max(128, _round_up(th_eff // 2, 128))
    while (_vmem_bytes(tm_eff, th_eff, Din_p, Dout_p, cbytes, out_bytes,
                       use_scratch) > budget and tm_eff > 128):
        tm_eff = max(128, _round_up(tm_eff // 2, 8))
    # TODO(synk): add a Dout tile axis for very large Din/Dout (not needed for
    # ViT-scale channel widths; the shrink loop above covers the rest).

    # Balanced row tiling: pad M only to a multiple of 8, split into
    # near-equal tiles instead of padding M up to a multiple of tm.
    n_m = max(1, _cdiv(M_8, tm_eff))
    if _SMALL_VMEM_CHIP and n_m == 1 and M_8 >= 512:
        n_m = 2  # give both v7x TensorCores a row tile on the parallel axis
    tm_eff = _round_up(_cdiv(M_8, n_m), 8)
    M_p = tm_eff * n_m

    # Balanced hidden tiling.
    n_h = max(1, _cdiv(H_128, th_eff))
    th_eff = _round_up(_cdiv(H_128, n_h), 128)
    H_p = th_eff * n_h

    def _pad2(a, rows, cols):
        pr, pc = rows - a.shape[0], cols - a.shape[1]
        if pr or pc:
            a = jnp.pad(a, ((0, pr), (0, pc)))
        return a

    # NOTE: for a production model, pre-pad/cast the (static) weights once
    # outside the per-call path; here they live in the jitted wrapper.
    xf = _pad2(x.reshape(M, Din).astype(cdt), M_p, Din_p)
    w1p = _pad2(w1.astype(cdt), Din_p, H_p)
    w2p = _pad2(w2.astype(cdt), H_p, Dout_p)
    b1p = _pad2(b1.astype(jnp.float32).reshape(1, H), 1, H_p)
    b2p = _pad2(b2.astype(jnp.float32).reshape(1, Dout), 1, Dout_p)

    if use_scratch:
        kernel = functools.partial(_mlp_kernel_scratch,
                                   approximate_gelu=approximate_gelu)
        scratch_shapes = [pltpu.VMEM((tm_eff, Dout_p), jnp.float32)]
    else:
        kernel = functools.partial(_mlp_kernel_f32out,
                                   approximate_gelu=approximate_gelu)
        scratch_shapes = []

    out = pl.pallas_call(
        kernel,
        out_shape=jax.ShapeDtypeStruct((M_p, Dout_p), out_dtype),
        grid_spec=pltpu.PrefetchScalarGridSpec(
            num_scalar_prefetch=0,
            grid=(n_m, n_h),  # reduction axis (H) innermost
            in_specs=[
                pl.BlockSpec((tm_eff, Din_p), lambda i, h: (i, 0)),   # x row-tile
                pl.BlockSpec((Din_p, th_eff), lambda i, h: (0, h)),   # w1 H-tile
                pl.BlockSpec((1, th_eff), lambda i, h: (0, h)),       # b1 H-tile
                pl.BlockSpec((th_eff, Dout_p), lambda i, h: (h, 0)),  # w2 H-tile
                pl.BlockSpec((1, Dout_p), lambda i, h: (0, 0)),       # b2 (full)
            ],
            out_specs=pl.BlockSpec((tm_eff, Dout_p), lambda i, h: (i, 0)),
            scratch_shapes=scratch_shapes,
        ),
        compiler_params=pltpu.CompilerParams(
            dimension_semantics=("parallel", "arbitrary"),
            vmem_limit_bytes=_VMEM_LIMIT_BYTES,
        ),
    )(xf, w1p, b1p, w2p, b2p)

    if M_p != M or Dout_p != Dout:
        out = out[:M, :Dout]
    return out.reshape(B, N, Dout)


def mlp_reference(x, w1, b1, w2, b2):
    h = jnp.einsum("bnd,dh->bnh", x, w1) + b1
    h = _gelu(h, approximate=False)
    return jnp.einsum("bnh,ho->bno", h, w2) + b2


if __name__ == "__main__":
    key = jax.random.PRNGKey(0)
    B, N = 2, 8                  # batch, sequence length (tokens)
    Din, H, Dout = 32, 64, 32    # in_features, hidden_features, out_features

    kx, k1, k2, k3, k4 = jax.random.split(key, 5)
    x = jax.random.normal(kx, (B, N, Din), dtype=jnp.float32)

    # Deterministic synthetic parameters (nn.Linear shapes, stored transposed).
    w1 = jax.random.normal(k1, (Din, H), dtype=jnp.float32) * 0.05
    b1 = jax.random.normal(k2, (H,), dtype=jnp.float32) * 0.05
    w2 = jax.random.normal(k3, (H, Dout), dtype=jnp.float32) * 0.05
    b2 = jax.random.normal(k4, (Dout,), dtype=jnp.float32) * 0.05

    y_ref = mlp_reference(x, w1, b1, w2, b2)

    # Default path: bf16 MXU operands, f32 accumulation / bias / GELU,
    # f32 output -> scratch-free output-accumulation kernel.
    y = jax.block_until_ready(mlp_pallas(x, w1, b1, w2, b2))
    assert y.shape == (B, N, Dout)
    assert jnp.allclose(y, y_ref, atol=3e-2, rtol=3e-2), "bf16 path mismatch"

    # Full-f32 compute path: tight parity with the reference.
    y32 = jax.block_until_ready(
        mlp_pallas(x, w1, b1, w2, b2, compute_dtype=jnp.float32))
    assert jnp.allclose(y32, y_ref, atol=1e-5, rtol=1e-5), "f32 path mismatch"

    # bf16 output dtype: exercises the f32-scratch accumulator kernel.
    yb = jax.block_until_ready(
        mlp_pallas(x.astype(jnp.bfloat16), w1, b1, w2, b2))
    assert yb.dtype == jnp.bfloat16
    assert jnp.allclose(yb.astype(jnp.float32), y_ref, atol=5e-2, rtol=5e-2), \
        "bf16-out path mismatch"

    print("KERNEL_OK")
</pallas_src>

<mosaic_0001>
module attributes {stable_mosaic.version = 11 : i64} {
  func.func @_mlp_kernel_f32out(%arg0: i32, %arg1: i32, %arg2: memref<16x128xbf16, #tpu.memory_space<vmem>>, %arg3: memref<128x128xbf16, #tpu.memory_space<vmem>>, %arg4: memref<1x128xf32, #tpu.memory_space<vmem>>, %arg5: memref<128x128xbf16, #tpu.memory_space<vmem>>, %arg6: memref<1x128xf32, #tpu.memory_space<vmem>>, %arg7: memref<16x128xf32, #tpu.memory_space<vmem>>) attributes {dimension_semantics = [#tpu.dimension_semantics<parallel>, #tpu.dimension_semantics<arbitrary>], iteration_bounds = array<i64: 1, 1>, scalar_prefetch = 0 : i64, scratch_operands = 0 : i64, tpu.core_type = #tpu.core_type<tc>, window_params = [{transform_indices = @transform_0, window_bounds = array<i64: 16, 128>}, {transform_indices = @transform_1, window_bounds = array<i64: 128, 128>}, {transform_indices = @transform_2, window_bounds = array<i64: 1, 128>}, {transform_indices = @transform_3, window_bounds = array<i64: 128, 128>}, {pipeline_mode = #tpu.pipeline_mode<synchronous>, transform_indices = @transform_4, window_bounds = array<i64: 1, 128>}, {transform_indices = @transform_5, window_bounds = array<i64: 16, 128>}]} {
    %c0_i32 = arith.constant 0 : i32
    %0 = arith.cmpi eq, %arg1, %c0_i32 : i32
    %1 = arith.extui %0 : i1 to i32
    %c0_i32_0 = arith.constant 0 : i32
    %2 = arith.cmpi ne, %1, %c0_i32_0 : i32
    scf.if %2 {
      %cst_18 = arith.constant 0.000000e+00 : f32
      %26 = vector.broadcast %cst_18 : f32 to vector<16x128xf32>
      %c0_19 = arith.constant 0 : index
      %c0_20 = arith.constant 0 : index
      %27 = vector.load %arg7[%c0_19, %c0_20] : memref<16x128xf32, #tpu.memory_space<vmem>>, vector<16x128xf32>
      tpu.vector_store %arg7[%c0_19, %c0_20], %26 {strides = array<i32>} : memref<16x128xf32, #tpu.memory_space<vmem>>, vector<16x128xf32>,
    } else {
    }
    %c0 = arith.constant 0 : index
    %c0_1 = arith.constant 0 : index
    %3 = vector.load %arg2[%c0, %c0_1] : memref<16x128xbf16, #tpu.memory_space<vmem>>, vector<16x128xbf16>
    %c0_2 = arith.constant 0 : index
    %c0_3 = arith.constant 0 : index
    %4 = vector.load %arg3[%c0_2, %c0_3] : memref<128x128xbf16, #tpu.memory_space<vmem>>, vector<128x128xbf16>
    %cst = arith.constant dense<0.000000e+00> : vector<16x128xf32>
    %5 = tpu.matmul %3, %4, %cst {dimension_numbers = #tpu.dot_dimension_numbers<[1], [0], [0], [1], [0, 0, 1, 1], [], []>} : vector<16x128xbf16>, vector<128x128xbf16>, vector<16x128xf32> -> vector<16x128xf32>
    %c0_4 = arith.constant 0 : index
    %c0_5 = arith.constant 0 : index
    %6 = vector.load %arg4[%c0_4, %c0_5] : memref<1x128xf32, #tpu.memory_space<vmem>>, vector<1x128xf32>
    %7 = vector.broadcast %6 : vector<1x128xf32> to vector<16x128xf32>
    %8 = arith.addf %5, %7 : vector<16x128xf32>
    %cst_6 = arith.constant 5.000000e-01 : f32
    %9 = vector.broadcast %cst_6 : f32 to vector<16x128xf32>
    %10 = arith.mulf %9, %8 : vector<16x128xf32>
    %cst_7 = arith.constant 0.707106769 : f32
    %11 = vector.broadcast %cst_7 : f32 to vector<16x128xf32>
    %12 = arith.mulf %8, %11 : vector<16x128xf32>
    %13 = math.erf %12 : vector<16x128xf32>
    %cst_8 = arith.constant 1.000000e+00 : f32
    %14 = vector.broadcast %cst_8 : f32 to vector<16x128xf32>
    %15 = arith.addf %14, %13 : vector<16x128xf32>
    %16 = arith.mulf %10, %15 : vector<16x128xf32>
    %c0_9 = arith.constant 0 : index
    %c0_10 = arith.constant 0 : index
    %17 = vector.load %arg7[%c0_9, %c0_10] : memref<16x128xf32, #tpu.memory_space<vmem>>, vector<16x128xf32>
    %18 = arith.truncf %16 : vector<16x128xf32> to vector<16x128xbf16>
    %c0_11 = arith.constant 0 : index
    %c0_12 = arith.constant 0 : index
    %19 = vector.load %arg5[%c0_11, %c0_12] : memref<128x128xbf16, #tpu.memory_space<vmem>>, vector<128x128xbf16>
    %cst_13 = arith.constant dense<0.000000e+00> : vector<16x128xf32>
    %20 = tpu.matmul %18, %19, %cst_13 {dimension_numbers = #tpu.dot_dimension_numbers<[1], [0], [0], [1], [0, 0, 1, 1], [], []>} : vector<16x128xbf16>, vector<128x128xbf16>, vector<16x128xf32> -> vector<16x128xf32>
    %21 = arith.addf %17, %20 : vector<16x128xf32>
    %c0_14 = arith.constant 0 : index
    %c0_15 = arith.constant 0 : index
    %22 = vector.load %arg7[%c0_14, %c0_15] : memref<16x128xf32, #tpu.memory_space<vmem>>, vector<16x128xf32>
    tpu.vector_store %arg7[%c0_14, %c0_15], %21 {strides = array<i32>} : memref<16x128xf32, #tpu.memory_space<vmem>>, vector<16x128xf32>,
    %c0_i32_16 = arith.constant 0 : i32
    %23 = arith.cmpi eq, %arg1, %c0_i32_16 : i32
    %24 = arith.extui %23 : i1 to i32
    %c0_i32_17 = arith.constant 0 : i32
    %25 = arith.cmpi ne, %24, %c0_i32_17 : i32
    scf.if %25 {
      %c0_18 = arith.constant 0 : index
      %c0_19 = arith.constant 0 : index
      %26 = vector.load %arg7[%c0_18, %c0_19] : memref<16x128xf32, #tpu.memory_space<vmem>>, vector<16x128xf32>
      %c0_20 = arith.constant 0 : index
      %c0_21 = arith.constant 0 : index
      %27 = vector.load %arg6[%c0_20, %c0_21] : memref<1x128xf32, #tpu.memory_space<vmem>>, vector<1x128xf32>
      %28 = vector.broadcast %27 : vector<1x128xf32> to vector<16x128xf32>
      %29 = arith.addf %26, %28 : vector<16x128xf32>
      %c0_22 = arith.constant 0 : index
      %c0_23 = arith.constant 0 : index
      %30 = vector.load %arg7[%c0_22, %c0_23] : memref<16x128xf32, #tpu.memory_space<vmem>>, vector<16x128xf32>
      tpu.vector_store %arg7[%c0_22, %c0_23], %29 {strides = array<i32>} : memref<16x128xf32, #tpu.memory_space<vmem>>, vector<16x128xf32>,
    } else {
    }
    return
  }
  func.func @transform_0(%arg0: i32, %arg1: i32) -> (i32, i32) {
    %c0_i32 = arith.constant 0 : i32
    %c0_i32_0 = arith.constant 0 : i32
    return %arg0, %c0_i32 : i32, i32
  }
  func.func @transform_1(%arg0: i32, %arg1: i32) -> (i32, i32) {
    %c0_i32 = arith.constant 0 : i32
    %c0_i32_0 = arith.constant 0 : i32
    return %c0_i32, %arg1 : i32, i32
  }
  func.func @transform_2(%arg0: i32, %arg1: i32) -> (i32, i32) {
    %c0_i32 = arith.constant 0 : i32
    %c0_i32_0 = arith.constant 0 : i32
    return %c0_i32, %arg1 : i32, i32
  }
  func.func @transform_3(%arg0: i32, %arg1: i32) -> (i32, i32) {
    %c0_i32 = arith.constant 0 : i32
    %c0_i32_0 = arith.constant 0 : i32
    return %arg1, %c0_i32 : i32, i32
  }
  func.func @transform_4(%arg0: i32, %arg1: i32) -> (i32, i32) {
    %c0_i32 = arith.constant 0 : i32
    %c0_i32_0 = arith.constant 0 : i32
    %c0_i32_1 = arith.constant 0 : i32
    return %c0_i32, %c0_i32_0 : i32, i32
  }
  func.func @transform_5(%arg0: i32, %arg1: i32) -> (i32, i32) {
    %c0_i32 = arith.constant 0 : i32
    %c0_i32_0 = arith.constant 0 : i32
    return %arg0, %c0_i32 : i32, i32
  }
}

</mosaic_0001>

<bundles_post_ra>
// kernel: mlp_pallas.1
= control target key start
LH: loop header
LB: loop body
LE: loop exit
PB: predicated region body
PF: predicated region fallthrough
CT: control target
= control target key end

     0   :  { %s511_s1 = inlined_call_operand.vmem [shape: bf16[128,128], index: 1, kind: input, shape index: {}]   ;;  %s512_s2 = inlined_call_operand.vmem [shape: f32[1,128], index: 2, kind: input, shape index: {}]   ;;  %s513_s0 = inlined_call_operand.vmem [shape: bf16[16,128], index: 0, kind: input, shape index: {}]   ;;  %s514_s4 = inlined_call_operand.vmem [shape: f32[1,128], index: 4, kind: input, shape index: {}]   ;;  %s515_s3 = inlined_call_operand.vmem [shape: bf16[128,128], index: 3, kind: input, shape index: {}]   ;;  %s516_s5 = inlined_call_operand.vmem [shape: f32[16,128], index: 5, kind: output, shape index: {}]  }
   0x1   :  { %v384_v0 = vld [vmem:[%s511_s1 + $0x38] sm:$0xff]  ;;  %v383_v1 = vld [vmem:[%s511_s1 + $0x30] sm:$0xff]  ;;  %v382_v2 = vld [vmem:[%s511_s1 + $0x28] sm:$0xff] }
   0x2   :  { %102 = vmatpush.bf16.msra.mxu0 %v384_v0  ;;  %v381_v3 = vld [vmem:[%s511_s1 + $0x20] sm:$0xff]  ;;  %v380_v4 = vld [vmem:[%s511_s1 + $0x18] sm:$0xff]  ;;  %v379_v5 = vld [vmem:[%s511_s1 + $0x10] sm:$0xff] }
   0x3   :  { %v378_v6 = vld [vmem:[%s511_s1 + $0x8] sm:$0xff]  ;;  %v377_v7 = vld [vmem:[%s511_s1] sm:$0xff]  ;;  %v392_v10 = vld [vmem:[%s515_s3 + $0x38] sm:$0xff] }
   0x4   :  { %v376_v8 = vld [vmem:[%s513_s0] sm:$0xff]  ;;  %271 = vmatpush.bf16.msra.mxu1 %v392_v10  ;;  %v391_v14 = vld [vmem:[%s515_s3 + $0x30] sm:$0xff]  ;;  %v390_v16 = vld [vmem:[%s515_s3 + $0x28] sm:$0xff] }
   0x5   :  { %v394_v9 = vld [vmem:[%s512_s2] ss:$0 sm:$0xff]  ;;  %v388_v27 = vld [vmem:[%s515_s3 + $0x18] sm:$0xff]  ;;  %v387_v33 = vld [vmem:[%s515_s3 + $0x10] sm:$0xff] }
   0x6   :  { %103 = vmatpush.bf16.msra.mxu0 %v383_v1  ;;  %v389_v21 = vld [vmem:[%s515_s3 + $0x20] sm:$0xff]  ;;  %v386_v41 = vld [vmem:[%s515_s3 + $0x8] sm:$0xff] }
   0x7   :  { %v385_v48 = vld [vmem:[%s515_s3] sm:$0xff] }
   0x8   :  { %272 = vmatpush.bf16.msra.mxu1 %v391_v14 }
   0xa   :  { %104 = vmatpush.bf16.msra.mxu0 %v382_v2 }
   0xc   :  { %273 = vmatpush.bf16.msra.mxu1 %v390_v16 }
   0xe   :  { %105 = vmatpush.bf16.msra.mxu0 %v381_v3 }
  0x10   :  { %274 = vmatpush.bf16.msra.mxu1 %v389_v21 }
  0x12   :  { %106 = vmatpush.bf16.msra.mxu0 %v380_v4 }
  0x14   :  { %275 = vmatpush.bf16.msra.mxu1 %v388_v27 }
  0x16   :  { %107 = vmatpush.bf16.msra.mxu0 %v379_v5 }
  0x18   :  { %276 = vmatpush.bf16.msra.mxu1 %v387_v33 }
  0x1a   :  { %108 = vmatpush.bf16.msra.mxu0 %v378_v6 }
  0x1c   :  { %277 = vmatpush.bf16.msra.mxu1 %v386_v41 }
  0x1e   :  { %109 = vmatpush.bf16.msra.mxu0 %v377_v7 }
  0x20   :  { %278 = vmatpush.bf16.msra.mxu1 %v385_v48 }
  0x21   :  { %110 = vmatmul.bf16.vlgmr.msra.gmra.mxu0 %v376_v8 }
  0x9e   :  { %v111_v11 = vpop.f32.mrf.mxu0 }
  0x9f   :  { %v463_v12 = vadd.f32 %v394_v9, %v111_v11 }
  0xa1   :  { %v466_v13 = vmul.f32 0.70710677, %v463_v12 }
  0xa3   :  { %v120_v15 = vmul.f32 %v466_v13, %v466_v13 }
  0xa5   :  { %v121_v17 = vmin.f32 %v120_v15, 16.0 }
  0xa6   :  { %v113_v18 = vpop.f32.mrf.mxu0 }
  0xa7   :  { %v122_v19 = vmul.f32 2.1237322e-06, %v121_v17  ;;  %v476_v20 = vadd.f32 %v394_v9, %v113_v18  ;;  %v133_v22 = vmul.f32 3.8918573e-05, %v121_v17 }
  0xa9   :  { %v123_v23 = vadd.f32 0.00028619796, %v122_v19  ;;  %v482_v24 = vmul.f32 0.70710677, %v476_v20  ;;  %v134_v25 = vadd.f32 0.001143296, %v133_v22 }
  0xab   :  { %v160_v26 = vmul.f32 %v482_v24, %v482_v24  ;;  %v124_v28 = vmul.f32 %v123_v23, %v121_v17  ;;  %v135_v29 = vmul.f32 %v134_v25, %v121_v17 }
  0xad   :  { %v161_v30 = vmin.f32 %v160_v26, 16.0  ;;  %v136_v31 = vadd.f32 0.014752088, %v135_v29  ;;  %v125_v35 = vadd.f32 0.0036580483, %v124_v28 }
  0xaf   :  { %v162_v32 = vmul.f32 2.1237322e-06, %v161_v30  ;;  %v173_v34 = vmul.f32 3.8918573e-05, %v161_v30  ;;  %v137_v36 = vmul.f32 %v136_v31, %v121_v17  ;;  %v126_v43 = vmul.f32 %v125_v35, %v121_v17 }
  0xb0   :  { %v117_v35 = vmul.f32 0.5, %v476_v20 }
  0xb1   :  { %v163_v37 = vadd.f32 0.00028619796, %v162_v32  ;;  %v174_v38 = vadd.f32 0.001143296, %v173_v34  ;;  %v138_v39 = vadd.f32 0.112945676, %v137_v36 }
  0xb2   :  { %v127_v50 = vadd.f32 0.05243302, %v126_v43  ;;  %v116_v34 = vmul.f32 0.5, %v463_v12 }
  0xb3   :  { %v164_v40 = vmul.f32 %v163_v37, %v161_v30  ;;  %v175_v42 = vmul.f32 %v174_v38, %v161_v30  ;;  %v139_v44 = vmul.f32 %v138_v39, %v121_v17 }
  0xb4   :  { %v128_v56 = vmul.f32 %v127_v50, %v121_v17 }
  0xb5   :  { %v165_v45 = vadd.f32 0.0036580483, %v164_v40  ;;  %v176_v46 = vadd.f32 0.014752088, %v175_v42  ;;  %v140_v47 = vadd.f32 0.4994258, %v139_v44 }
  0xb6   :  { %v129_v60 = vadd.f32 0.18741608, %v128_v56 }
  0xb7   :  { %v177_v49 = vmul.f32 %v176_v46, %v161_v30  ;;  %v141_v51 = vmul.f32 %v140_v47, %v121_v17  ;;  %v166_v52 = vmul.f32 %v165_v45, %v161_v30 }
  0xb8   :  { %v130_v1 = vmul.f32 %v129_v60, %v121_v17 }
  0xb9   :  { %v178_v53 = vadd.f32 0.112945676, %v177_v49  ;;  %v142_v54 = vadd.f32 1.0, %v141_v51  ;;  %v167_v57 = vadd.f32 0.05243302, %v166_v52 }
  0xba   :  { %v131_v7 = vadd.f32 1.1283791, %v130_v1 }
  0xbb   :  { %v179_v55 = vmul.f32 %v178_v53, %v161_v30  ;;  %396 = vrcp.f32 %v142_v54  ;;  %v168_v61 = vmul.f32 %v167_v57, %v161_v30  ;;  %v154_v4 = vand.u32 2147483648, %v142_v54 }
  0xbc   :  { %v152_v6 = vand.u32 2147483647, %v142_v54  ;;  %vm148_vm1 = vweird.f32 %v142_v54  ;;  %v132_v16 = vmul.f32 %v131_v7, %v466_v13 }
  0xbd   :  { %v180_v58 = vadd.f32 0.4994258, %v179_v55  ;;  %v169_v2 = vadd.f32 0.18741608, %v168_v61  ;;  %v155_v11 = vor.u32 1.1754944e-38, %v154_v4 }
  0xbe   :  { %vm153_vm3 = vcmp.eq.f32.partialorder %v152_v6, 8.507059e+37 }
  0xbf   :  { %v181_v59 = vmul.f32 %v180_v58, %v161_v30  ;;  %v170_v9 = vmul.f32 %v169_v2, %v161_v30 }
  0xc1   :  { %v182_v62 = vadd.f32 1.0, %v181_v59  ;;  %v397_v63 = vpop.eup %396  ;;  %v171_v19 = vadd.f32 1.1283791, %v170_v9 }
  0xc2   :  { %v144_v0 = vmul.f32 %v397_v63, %v142_v54  ;;  %vm149_vm0 = vweird.f32 %v397_v63 }
  0xc3   :  { %398 = vrcp.f32 %v182_v62  ;;  %vm150_vm2 = vmor %vm148_vm1, %vm149_vm0  ;;  %v194_v21 = vand.u32 2147483648, %v182_v62  ;;  %v192_v25 = vand.u32 2147483647, %v182_v62  ;;  %vm188_vm5 = vweird.f32 %v182_v62 }
  0xc4   :  { %v145_v3 = vsub.f32 1.0, %v144_v0  ;;  %v172_v28 = vmul.f32 %v171_v19, %v482_v24  ;;  %v395_v24 = vld [vmem:[%s514_s4] ss:$0 sm:$0xff] }
  0xc5   :  { %v195_v27 = vor.u32 1.1754944e-38, %v194_v21  ;;  %vm193_vm7 = vcmp.eq.f32.partialorder %v192_v25, 8.507059e+37 }
  0xc6   :  { %v146_v5 = vmul.f32 %v397_v63, %v145_v3 }
  0xc8   :  { %v147_v10 = vadd.f32 %v397_v63, %v146_v5 }
  0xc9   :  { %v399_v8 = vpop.eup %398 }
  0xca   :  { %v184_v14 = vmul.f32 %v399_v8, %v182_v62  ;;  %v151_v15 = vsel %vm150_vm2, %v397_v63, %v147_v10  ;;  %vm189_vm4 = vweird.f32 %v399_v8 }
  0xcb   :  { %v156_v18 = vsel %vm153_vm3, %v155_v11, %v151_v15  ;;  %vm190_vm6 = vmor %vm188_vm5, %vm189_vm4 }
  0xcc   :  { %v185_v17 = vsub.f32 1.0, %v184_v14  ;;  %v157_v22 = vmul.f32 %v156_v18, %v132_v16 }
  0xce   :  { %v186_v23 = vmul.f32 %v399_v8, %v185_v17  ;;  %v342_v29 = vclamps-f32 %v157_v22, 1.0 }
  0xd0   :  { %v187_v26 = vadd.f32 %v399_v8, %v186_v23  ;;  %v200_v33 = vadd.f32 1.0, %v342_v29 }
  0xd2   :  { %v191_v30 = vsel %vm190_vm6, %v399_v8, %v187_v26  ;;  %v202_v37 = vmul.f32 %v200_v33, %v116_v34 }
  0xd3   :  { %v196_v31 = vsel %vm193_vm7, %v195_v27, %v191_v30 }
  0xd4   :  { %v197_v32 = vmul.f32 %v196_v31, %v172_v28 }
  0xd6   :  { %v343_v13 = vclamps-f32 %v197_v32, 1.0 }
  0xd8   :  { %v201_v36 = vadd.f32 1.0, %v343_v13 }
  0xda   :  { %v203_v38 = vmul.f32 %v201_v36, %v117_v35 }
  0xdc   :  { %v206_v39 = vpack.c.bf16 %v203_v38, %v202_v37 }
  0xde   :  { %279 = vmatmul.bf16.vlgmr.msra.gmra.mxu1 %v206_v39 }
 0x15b   :  { %v280_v40 = vpop.f32.mrf.mxu1 }
 0x15c   :  { %v298_v41 = vadd.f32 %v395_v24, %v280_v40 }
 0x15e   :  { %300 = vst [vmem:[%s516_s5] sm:$0xff] %v298_v41 }
 0x163   :  { %v282_v42 = vpop.f32.mrf.mxu1 }
 0x164   :  { %v299_v43 = vadd.f32 %v395_v24, %v282_v42 }
 0x166   :  { %301 = vst [vmem:[%s516_s5 + $0x8] sm:$0xff] %v299_v43 }

</bundles_post_ra>
